<compile_context>
chip_gen: v5e
topology: v5e:2x2
jax: 0.10.0
libtpu: 0.0.40
codegen_flags: <defaults>
</compile_context>

<pallas_src>
import functools
import math

import jax
import jax.numpy as jnp
from jax.experimental import pallas as pl
from jax.experimental.pallas import tpu as pltpu

EA_W = 16          # packed attention-logit slab width: [el_0..7 | er_0..7]
MAX_HEADS = 8      # heads per layer must fit in half the slab
NEG_INF = -1e9     # softmax mask value for non-edges

_SINGLE_BUFFER = True   # flipped off at runtime if pl.Buffered(1) is rejected


def _round_up(x, m):
    return ((x + m - 1) // m) * m


def _resident_spec(shape, single_buffer):
    """Block-invariant input (constant index map); single-buffer when supported."""
    if single_buffer and hasattr(pl, "Buffered"):
        try:
            return pl.BlockSpec(shape, lambda i: (0, 0), pipeline_mode=pl.Buffered(1))
        except Exception:
            pass
    return pl.BlockSpec(shape, lambda i: (0, 0))


def _vmem_limit(est_bytes):
    # Never below the generation defaults; cap well under v5e/v6e physical VMEM.
    return int(max(32 << 20, min(2 * est_bytes + (4 << 20), 100 << 20)))


# ------------------------------ Pallas kernels ------------------------------ #
def _project_kernel(x_ref, wbig_ref, z_ref, ea_ref, *, z_width):
    # y = x @ [W_heads | W@a_l | W@a_r]  (single MXU pass, f32 accumulate)
    y = jnp.dot(x_ref[...], wbig_ref[...], preferred_element_type=jnp.float32)
    z_ref[...] = y[:, :z_width].astype(z_ref.dtype)    # per-head features
    ea_ref[...] = y[:, z_width:].astype(ea_ref.dtype)  # [el_0..7 | er_0..7]


def _project_fc_kernel(x_ref, wfc_ref, wbig_ref, z_ref, ea_ref, *, z_width):
    # Layer 0: fuse the per-type input projection (block-diagonal W + one-hot bias)
    # with the first GATConv projection; the fc output never touches HBM.
    h0 = jnp.dot(x_ref[...], wfc_ref[...], preferred_element_type=jnp.float32)
    y = jnp.dot(h0.astype(jnp.bfloat16), wbig_ref[...],
                preferred_element_type=jnp.float32)
    z_ref[...] = y[:, :z_width].astype(z_ref.dtype)
    ea_ref[...] = y[:, z_width:].astype(ea_ref.dtype)


def _gat_attn_kernel(*refs, num_heads, dp, neg_slope, residual, mean_heads,
                     apply_elu):
    # refs layout depends on the (static) residual mode.
    if residual == "linear":
        z_ref, elt_ref, ea_ref, adjm_ref, hin_ref, wres_ref, o_ref = refs
    elif residual == "identity":
        z_ref, elt_ref, ea_ref, adjm_ref, hin_ref, o_ref = refs
        wres_ref = None
    else:
        z_ref, elt_ref, ea_ref, adjm_ref, o_ref = refs
        hin_ref = wres_ref = None

    z_all = z_ref[...]            # [N_pad, H*dp]  bf16  (all source nodes, resident)
    el_all = elt_ref[...]         # [8, N_pad]     f32   (el per source, resident)
    ea = ea_ref[...]              # [TM, 16]       f32   (cols 8..15 hold er for dst)
    mask = adjm_ref[...] > 0      # [TM, N_pad]    bool  (edge / self-loop)

    head_outs = []
    for hd in range(num_heads):                            # small, unrolled
        er_h = ea[:, MAX_HEADS + hd:MAX_HEADS + hd + 1]    # [TM, 1]
        el_h = el_all[hd:hd + 1, :]                        # [1, N_pad]
        e = er_h + el_h                                    # outer sum [TM, N_pad]
        e = jnp.where(e >= 0, e, neg_slope * e)            # LeakyReLU
        e = jnp.where(mask, e, NEG_INF)                    # mask non-edges
        m = jnp.max(e, axis=1, keepdims=True)
        p = jnp.exp(e - m)                                 # unnormalised probs
        s = jnp.sum(p, axis=1, keepdims=True)
        # normalise AFTER the aggregation matmul (per-[TM,dp] scale instead of a
        # per-[TM,N_pad] multiply); guard fully-masked rows (m still at NEG_INF).
        inv = jnp.where(m > 0.5 * NEG_INF,
                        pl.reciprocal(s, approx=True), 0.0)
        zh = z_all[:, hd * dp:(hd + 1) * dp]               # [N_pad, dp]
        agg = jnp.dot(p.astype(z_all.dtype), zh,
                      preferred_element_type=jnp.float32)  # [TM, dp]
        head_outs.append(agg * inv)

    if residual != "none":
        hin = hin_ref[...]
        if residual == "linear":
            res = jnp.dot(hin, wres_ref[...], preferred_element_type=jnp.float32)
        else:
            res = hin.astype(jnp.float32)
        head_outs = [o + res[:, hd * dp:(hd + 1) * dp]
                     for hd, o in enumerate(head_outs)]

    if mean_heads:                                   # final layer: .mean(1)
        out = head_outs[0]
        for o in head_outs[1:]:
            out = out + o
        out = out * (1.0 / num_heads)
    else:
        out = jnp.concatenate(head_outs, axis=1)     # flatten(1)

    if apply_elu:
        out = jnp.where(out > 0, out, jnp.exp(jnp.minimum(out, 0.0)) - 1.0)

    o_ref[...] = out.astype(o_ref.dtype)


# ----------------------------- kernel wrappers ------------------------------ #
def _project_call(x, wbig, *, z_width, tm, fc_w, single_buffer):
    n_pad, kx = x.shape
    assert n_pad % tm == 0
    grid = (n_pad // tm,)
    out_shape = (jax.ShapeDtypeStruct((n_pad, z_width), jnp.bfloat16),
                 jax.ShapeDtypeStruct((n_pad, EA_W), jnp.float32))

    in_specs = [pl.BlockSpec((tm, kx), lambda i: (i, 0))]
    args = [x]
    est = 2 * tm * kx * x.dtype.itemsize            # double-buffered input tile
    if fc_w is not None:
        in_specs.append(_resident_spec(fc_w.shape, single_buffer))
        args.append(fc_w)
        est += fc_w.size * fc_w.dtype.itemsize
    in_specs.append(_resident_spec(wbig.shape, single_buffer))
    args.append(wbig)
    est += wbig.size * wbig.dtype.itemsize
    est += 2 * (tm * z_width * 2 + tm * EA_W * 4)   # double-buffered output tiles

    kernel = functools.partial(
        _project_fc_kernel if fc_w is not None else _project_kernel,
        z_width=z_width)
    return pl.pallas_call(
        kernel,
        out_shape=out_shape,
        grid=grid,
        in_specs=in_specs,
        out_specs=(pl.BlockSpec((tm, z_width), lambda i: (i, 0)),
                   pl.BlockSpec((tm, EA_W), lambda i: (i, 0))),
        compiler_params=pltpu.CompilerParams(
            dimension_semantics=("parallel",),
            vmem_limit_bytes=_vmem_limit(est)),
    )(*args)


def _project(x, wbig, *, z_width, tm, fc_w=None):
    global _SINGLE_BUFFER
    try:
        return _project_call(x, wbig, z_width=z_width, tm=tm, fc_w=fc_w,
                             single_buffer=_SINGLE_BUFFER)
    except Exception:
        if not _SINGLE_BUFFER:
            raise
        _SINGLE_BUFFER = False
        return _project_call(x, wbig, z_width=z_width, tm=tm, fc_w=fc_w,
                             single_buffer=False)


def _gat_attention_call(z, el_t, ea, adj_mask, *, num_heads, dp, neg_slope,
                        residual, mean_heads, apply_elu, tm, out_dtype,
                        hin, wres, single_buffer):
    n_pad = z.shape[0]
    assert n_pad % tm == 0
    grid = (n_pad // tm,)
    ow = dp if mean_heads else num_heads * dp

    in_specs = [_resident_spec(z.shape, single_buffer),       # all sources, resident
                _resident_spec(el_t.shape, single_buffer),    # el per source, resident
                pl.BlockSpec((tm, EA_W), lambda i: (i, 0)),
                pl.BlockSpec((tm, n_pad), lambda i: (i, 0))]  # int8 edge-mask rows
    args = [z, el_t, ea, adj_mask]
    est = (z.size * z.dtype.itemsize + el_t.size * el_t.dtype.itemsize
           + 2 * tm * EA_W * 4
           + 2 * tm * n_pad * adj_mask.dtype.itemsize
           + 2 * tm * ow * jnp.dtype(out_dtype).itemsize)
    if residual != "none":
        in_specs.append(pl.BlockSpec((tm, hin.shape[1]), lambda i: (i, 0)))
        args.append(hin)
        est += 2 * tm * hin.shape[1] * hin.dtype.itemsize
    if residual == "linear":
        in_specs.append(_resident_spec(wres.shape, single_buffer))
        args.append(wres)
        est += wres.size * wres.dtype.itemsize

    kernel = functools.partial(
        _gat_attn_kernel, num_heads=num_heads, dp=dp, neg_slope=neg_slope,
        residual=residual, mean_heads=mean_heads, apply_elu=apply_elu)
    return pl.pallas_call(
        kernel,
        out_shape=jax.ShapeDtypeStruct((n_pad, ow), out_dtype),
        grid=grid,
        in_specs=in_specs,
        out_specs=pl.BlockSpec((tm, ow), lambda i: (i, 0)),
        compiler_params=pltpu.CompilerParams(
            dimension_semantics=("parallel",),
            vmem_limit_bytes=_vmem_limit(est)),
    )(*args)


def _gat_attention(z, el_t, ea, adj_mask, **kw):
    global _SINGLE_BUFFER
    try:
        return _gat_attention_call(z, el_t, ea, adj_mask,
                                   single_buffer=_SINGLE_BUFFER, **kw)
    except Exception:
        if not _SINGLE_BUFFER:
            raise
        _SINGLE_BUFFER = False
        return _gat_attention_call(z, el_t, ea, adj_mask,
                                   single_buffer=False, **kw)


# ---------------------------- parameter handling ---------------------------- #
def init_params(key, in_dims, num_hidden, num_classes, num_layers, heads, residual):
    gain = 1.414
    params = {"fc": [], "gat": []}
    for in_dim in in_dims:
        key, kw, kb = jax.random.split(key, 3)
        std = gain * math.sqrt(2.0 / (in_dim + num_hidden))
        w = (std * jax.random.normal(kw, (in_dim, num_hidden))).astype(jnp.float32)
        bound = 1.0 / math.sqrt(in_dim)
        b = jax.random.uniform(kb, (num_hidden,), jnp.float32, -bound, bound)
        params["fc"].append((w, b))

    specs = [(num_hidden, num_hidden, heads[0], False)]
    for l in range(1, num_layers):
        specs.append((num_hidden * heads[l - 1], num_hidden, heads[l], residual))
    specs.append((num_hidden * heads[-2], num_classes, heads[-1], residual))

    for fin, fout, nh, res in specs:
        key, kw, kl, kr, ks = jax.random.split(key, 5)
        std = gain * math.sqrt(2.0 / (fin + nh * fout))
        W = (std * jax.random.normal(kw, (fin, nh * fout))).astype(jnp.float32)
        std_a = gain * math.sqrt(2.0 / (fout + 1))
        al = (std_a * jax.random.normal(kl, (nh, fout))).astype(jnp.float32)
        ar = (std_a * jax.random.normal(kr, (nh, fout))).astype(jnp.float32)
        wres = None
        if res and fin != nh * fout:
            stdr = math.sqrt(2.0 / (fin + nh * fout))
            wres = (stdr * jax.random.normal(ks, (fin, nh * fout))).astype(jnp.float32)
        params["gat"].append(dict(W=W, al=al, ar=ar, res=res, wres=wres,
                                  num_heads=nh, out_feats=fout))
    return params


def pack_params(params, negative_slope=0.2):
    """Precompute kernel-facing weights: block-diagonal fc (bias via one-hot row),
    [W | W@a_l | W@a_r] projection slabs, lane-padded final-layer weights."""
    hid = params["fc"][0][0].shape[1]
    k_list = [w.shape[0] for (w, _) in params["fc"]]
    k_sum = sum(k_list)
    n_types = len(k_list)
    k_aug = _round_up(k_sum + n_types, 8)

    wfc = jnp.zeros((k_aug, hid), jnp.float32)
    offsets, off = [], 0
    for t, (w, b) in enumerate(params["fc"]):
        offsets.append(off)
        wfc = wfc.at[off:off + k_list[t], :].set(w)
        wfc = wfc.at[k_sum + t, :].set(b)          # bias row, selected by one-hot col
        off += k_list[t]

    layers = []
    num_l = len(params["gat"])
    for li, lp in enumerate(params["gat"]):
        nh, fout, fin = lp["num_heads"], lp["out_feats"], lp["W"].shape[0]
        is_final = li == num_l - 1
        dp = _round_up(fout, 128) if is_final else fout      # lane-dense final classes
        assert nh <= MAX_HEADS
        Wp = jnp.zeros((fin, nh * dp), jnp.float32)
        alp = jnp.zeros((nh, dp), jnp.float32).at[:, :fout].set(lp["al"])
        arp = jnp.zeros((nh, dp), jnp.float32).at[:, :fout].set(lp["ar"])
        for hd in range(nh):
            Wp = Wp.at[:, hd * dp:hd * dp + fout].set(lp["W"][:, hd * fout:(hd + 1) * fout])
        attn_cols = jnp.zeros((fin, EA_W), jnp.float32)
        for hd in range(nh):                                  # el = h @ (W_h a_l_h)
            attn_cols = attn_cols.at[:, hd].set(Wp[:, hd * dp:(hd + 1) * dp] @ alp[hd])
            attn_cols = attn_cols.at[:, MAX_HEADS + hd].set(
                Wp[:, hd * dp:(hd + 1) * dp] @ arp[hd])
        wbig = jnp.concatenate([Wp, attn_cols], axis=1).astype(jnp.bfloat16)

        res_mode, wres = "none", None
        if lp["res"]:
            if lp["wres"] is None:
                res_mode = "identity"
            else:
                res_mode = "linear"
                Wr = jnp.zeros((fin, nh * dp), jnp.float32)
                for hd in range(nh):
                    Wr = Wr.at[:, hd * dp:hd * dp + fout].set(
                        lp["wres"][:, hd * fout:(hd + 1) * fout])
                wres = Wr.astype(jnp.bfloat16)

        layers.append(dict(wbig=wbig, wres=wres, res_mode=res_mode, num_heads=nh,
                           dp=dp, out_feats=fout, mean_heads=is_final,
                           apply_elu=not is_final))
    return dict(wfc=wfc.astype(jnp.bfloat16), k_aug=k_aug, k_sum=k_sum,
                k_offsets=offsets, hid=hid, layers=layers, neg_slope=negative_slope)


# -------------------------------- forward ----------------------------------- #
def gat_forward(packed, features_list, adj_mask, *, tm=128):
    """adj_mask: [N_pad, N_pad] int8 (1 = edge / self-loop, 0 = no edge).
    tm: row tile; 256-512 on v5e/v6e for bigger graphs, <=256 on v7x (64 MiB VMEM);
    keep N_pad // tm even so both v7x TensorCores get work."""
    n = sum(f.shape[0] for f in features_list)
    n_pad = adj_mask.shape[0]
    k_aug, k_sum = packed["k_aug"], packed["k_sum"]

    # block-diagonal augmented input (features in per-type column ranges + one-hot
    # type column for the fc bias) — replaces the per-type fc calls + concat.
    blocks = []
    for t, f in enumerate(features_list):
        blk = jnp.zeros((f.shape[0], k_aug), jnp.float32)
        blk = blk.at[:, packed["k_offsets"][t]:packed["k_offsets"][t] + f.shape[1]].set(f)
        blk = blk.at[:, k_sum + t].set(1.0)
        blocks.append(blk)
    x_aug = jnp.concatenate(blocks, axis=0)
    x_aug = jnp.pad(x_aug, ((0, n_pad - n), (0, 0))).astype(jnp.bfloat16)

    h = x_aug
    encoded = None
    num_l = len(packed["layers"])
    for li, L in enumerate(packed["layers"]):
        zw = L["num_heads"] * L["dp"]
        z, ea = _project(h, L["wbig"], z_width=zw, tm=tm,
                         fc_w=(packed["wfc"] if li == 0 else None))
        # tiny [N_pad, 8] -> [8, N_pad] transpose (el logits along the lane axis);
        # kept on the host to avoid an in-kernel narrow transpose.
        el_t = jnp.transpose(ea[:, :MAX_HEADS])
        out_dtype = jnp.float32 if L["mean_heads"] else jnp.bfloat16
        h_next = _gat_attention(
            z, el_t, ea, adj_mask, num_heads=L["num_heads"], dp=L["dp"],
            neg_slope=packed["neg_slope"], residual=L["res_mode"],
            mean_heads=L["mean_heads"], apply_elu=L["apply_elu"], tm=tm,
            out_dtype=out_dtype,
            hin=(h if L["res_mode"] != "none" else None), wres=L["wres"])
        if li < num_l - 1:
            encoded = h_next
        h = h_next

    logits = h[:n, :packed["layers"][-1]["out_feats"]]
    encoded = encoded[:n].astype(jnp.float32)
    return logits, encoded


# ---------------------------------- demo ------------------------------------ #
if __name__ == "__main__":
    key = jax.random.PRNGKey(0)

    in_dims = [8, 12]          # two node types with different feature widths
    num_hidden = 32
    num_classes = 5
    num_layers = 2
    heads = [4, 4, 1]          # heads[-1] for the output GATConv
    negative_slope = 0.2
    residual = True
    n_nodes = [150, 90]        # 240 nodes total
    tm = 128                   # demo pads N to 256 -> even grid of 2 row tiles

    key, k1, k2, kg, kp = jax.random.split(key, 5)
    features_list = [
        jax.random.normal(k1, (n_nodes[0], in_dims[0]), jnp.float32),
        jax.random.normal(k2, (n_nodes[1], in_dims[1]), jnp.float32),
    ]
    n = sum(n_nodes)
    n_pad = _round_up(n, 2 * tm)   # even grid keeps both v7x TensorCores busy

    # random symmetric graph + self-loops, stored as an int8 edge mask at padded size
    adj = (jax.random.uniform(kg, (n, n)) < 0.05)
    adj = jnp.logical_or(adj, adj.T)
    mask_full = jnp.zeros((n_pad, n_pad), bool).at[:n, :n].set(adj)
    mask_full = mask_full.at[jnp.arange(n_pad), jnp.arange(n_pad)].set(True)
    adj_mask = mask_full.astype(jnp.int8)

    params = init_params(kp, in_dims, num_hidden, num_classes, num_layers,
                         heads, residual)
    packed = pack_params(params, negative_slope)

    logits, encoded = gat_forward(packed, features_list, adj_mask, tm=tm)
    jax.block_until_ready((logits, encoded))

    assert logits.shape == (n, num_classes)
    assert encoded.shape == (n, num_hidden * heads[num_layers - 1])
    assert bool(jnp.all(jnp.isfinite(logits)))
    assert bool(jnp.all(jnp.isfinite(encoded)))
    print("KERNEL_OK")
</pallas_src>

<mosaic_0001>
module attributes {stable_mosaic.version = 11 : i64} {
  func.func @_project_fc_kernel(%arg0: i32, %arg1: memref<128x24xbf16, #tpu.memory_space<vmem>>, %arg2: memref<24x32xbf16, #tpu.memory_space<vmem>>, %arg3: memref<32x144xbf16, #tpu.memory_space<vmem>>, %arg4: memref<128x128xbf16, #tpu.memory_space<vmem>>, %arg5: memref<128x16xf32, #tpu.memory_space<vmem>>) attributes {dimension_semantics = [#tpu.dimension_semantics<parallel>], iteration_bounds = array<i64: 2>, scalar_prefetch = 0 : i64, scratch_operands = 0 : i64, tpu.core_type = #tpu.core_type<tc>, window_params = [{transform_indices = @transform_0, window_bounds = array<i64: 128, 24>}, {pipeline_mode = #tpu.pipeline_mode<synchronous>, transform_indices = @transform_1, window_bounds = array<i64: 24, 32>}, {pipeline_mode = #tpu.pipeline_mode<synchronous>, transform_indices = @transform_2, window_bounds = array<i64: 32, 144>}, {transform_indices = @transform_3, window_bounds = array<i64: 128, 128>}, {transform_indices = @transform_4, window_bounds = array<i64: 128, 16>}]} {
    %c0 = arith.constant 0 : index
    %c0_0 = arith.constant 0 : index
    %0 = vector.load %arg1[%c0, %c0_0] : memref<128x24xbf16, #tpu.memory_space<vmem>>, vector<128x24xbf16>
    %c0_1 = arith.constant 0 : index
    %c0_2 = arith.constant 0 : index
    %1 = vector.load %arg2[%c0_1, %c0_2] : memref<24x32xbf16, #tpu.memory_space<vmem>>, vector<24x32xbf16>
    %cst = arith.constant dense<0.000000e+00> : vector<128x32xf32>
    %2 = tpu.matmul %0, %1, %cst {dimension_numbers = #tpu.dot_dimension_numbers<[1], [0], [0], [1], [0, 0, 1, 1], [], []>} : vector<128x24xbf16>, vector<24x32xbf16>, vector<128x32xf32> -> vector<128x32xf32>
    %3 = arith.truncf %2 : vector<128x32xf32> to vector<128x32xbf16>
    %c0_3 = arith.constant 0 : index
    %c0_4 = arith.constant 0 : index
    %4 = vector.load %arg3[%c0_3, %c0_4] : memref<32x144xbf16, #tpu.memory_space<vmem>>, vector<32x144xbf16>
    %cst_5 = arith.constant dense<0.000000e+00> : vector<128x144xf32>
    %5 = tpu.matmul %3, %4, %cst_5 {dimension_numbers = #tpu.dot_dimension_numbers<[1], [0], [0], [1], [0, 0, 1, 1], [], []>} : vector<128x32xbf16>, vector<32x144xbf16>, vector<128x144xf32> -> vector<128x144xf32>
    %6 = vector.extract_strided_slice %5 {offsets = [0, 0], sizes = [128, 128], strides = [1, 1]} : vector<128x144xf32> to vector<128x128xf32>
    %7 = arith.truncf %6 : vector<128x128xf32> to vector<128x128xbf16>
    %c0_6 = arith.constant 0 : index
    %c0_7 = arith.constant 0 : index
    %8 = vector.load %arg4[%c0_6, %c0_7] : memref<128x128xbf16, #tpu.memory_space<vmem>>, vector<128x128xbf16>
    tpu.vector_store %arg4[%c0_6, %c0_7], %7 {strides = array<i32>} : memref<128x128xbf16, #tpu.memory_space<vmem>>, vector<128x128xbf16>,
    %9 = vector.extract_strided_slice %5 {offsets = [0, 128], sizes = [128, 16], strides = [1, 1]} : vector<128x144xf32> to vector<128x16xf32>
    %c0_8 = arith.constant 0 : index
    %c0_9 = arith.constant 0 : index
    %10 = vector.load %arg5[%c0_8, %c0_9] : memref<128x16xf32, #tpu.memory_space<vmem>>, vector<128x16xf32>
    tpu.vector_store %arg5[%c0_8, %c0_9], %9 {strides = array<i32>} : memref<128x16xf32, #tpu.memory_space<vmem>>, vector<128x16xf32>,
    return
  }
  func.func @transform_0(%arg0: i32) -> (i32, i32) {
    %c0_i32 = arith.constant 0 : i32
    %c0_i32_0 = arith.constant 0 : i32
    return %arg0, %c0_i32 : i32, i32
  }
  func.func @transform_1(%arg0: i32) -> (i32, i32) {
    %c0_i32 = arith.constant 0 : i32
    %c0_i32_0 = arith.constant 0 : i32
    %c0_i32_1 = arith.constant 0 : i32
    return %c0_i32, %c0_i32_0 : i32, i32
  }
  func.func @transform_2(%arg0: i32) -> (i32, i32) {
    %c0_i32 = arith.constant 0 : i32
    %c0_i32_0 = arith.constant 0 : i32
    %c0_i32_1 = arith.constant 0 : i32
    return %c0_i32, %c0_i32_0 : i32, i32
  }
  func.func @transform_3(%arg0: i32) -> (i32, i32) {
    %c0_i32 = arith.constant 0 : i32
    %c0_i32_0 = arith.constant 0 : i32
    return %arg0, %c0_i32 : i32, i32
  }
  func.func @transform_4(%arg0: i32) -> (i32, i32) {
    %c0_i32 = arith.constant 0 : i32
    %c0_i32_0 = arith.constant 0 : i32
    return %arg0, %c0_i32 : i32, i32
  }
}

module attributes {stable_mosaic.version = 11 : i64} {
  func.func @_project_fc_kernel(%arg0: i32, %arg1: memref<128x24xbf16, #tpu.memory_space<vmem>>, %arg2: memref<24x32xbf16, #tpu.memory_space<vmem>>, %arg3: memref<32x144xbf16, #tpu.memory_space<vmem>>, %arg4: memref<128x128xbf16, #tpu.memory_space<vmem>>, %arg5: memref<128x16xf32, #tpu.memory_space<vmem>>) attributes {dimension_semantics = [#tpu.dimension_semantics<parallel>], iteration_bounds = array<i64: 2>, scalar_prefetch = 0 : i64, scratch_operands = 0 : i64, tpu.core_type = #tpu.core_type<tc>, window_params = [{transform_indices = @transform_0, window_bounds = array<i64: 128, 24>}, {pipeline_mode = #tpu.pipeline_mode<synchronous>, transform_indices = @transform_1, window_bounds = array<i64: 24, 32>}, {pipeline_mode = #tpu.pipeline_mode<synchronous>, transform_indices = @transform_2, window_bounds = array<i64: 32, 144>}, {transform_indices = @transform_3, window_bounds = array<i64: 128, 128>}, {transform_indices = @transform_4, window_bounds = array<i64: 128, 16>}]} {
    %c0 = arith.constant 0 : index
    %c0_0 = arith.constant 0 : index
    %0 = vector.load %arg1[%c0, %c0_0] : memref<128x24xbf16, #tpu.memory_space<vmem>>, vector<128x24xbf16>
    %c0_1 = arith.constant 0 : index
    %c0_2 = arith.constant 0 : index
    %1 = vector.load %arg2[%c0_1, %c0_2] : memref<24x32xbf16, #tpu.memory_space<vmem>>, vector<24x32xbf16>
    %cst = arith.constant dense<0.000000e+00> : vector<128x32xf32>
    %2 = tpu.matmul %0, %1, %cst {dimension_numbers = #tpu.dot_dimension_numbers<[1], [0], [0], [1], [0, 0, 1, 1], [], []>} : vector<128x24xbf16>, vector<24x32xbf16>, vector<128x32xf32> -> vector<128x32xf32>
    %3 = arith.truncf %2 : vector<128x32xf32> to vector<128x32xbf16>
    %c0_3 = arith.constant 0 : index
    %c0_4 = arith.constant 0 : index
    %4 = vector.load %arg3[%c0_3, %c0_4] : memref<32x144xbf16, #tpu.memory_space<vmem>>, vector<32x144xbf16>
    %cst_5 = arith.constant dense<0.000000e+00> : vector<128x144xf32>
    %5 = tpu.matmul %3, %4, %cst_5 {dimension_numbers = #tpu.dot_dimension_numbers<[1], [0], [0], [1], [0, 0, 1, 1], [], []>} : vector<128x32xbf16>, vector<32x144xbf16>, vector<128x144xf32> -> vector<128x144xf32>
    %6 = vector.extract_strided_slice %5 {offsets = [0, 0], sizes = [128, 128], strides = [1, 1]} : vector<128x144xf32> to vector<128x128xf32>
    %7 = arith.truncf %6 : vector<128x128xf32> to vector<128x128xbf16>
    %c0_6 = arith.constant 0 : index
    %c0_7 = arith.constant 0 : index
    %8 = vector.load %arg4[%c0_6, %c0_7] : memref<128x128xbf16, #tpu.memory_space<vmem>>, vector<128x128xbf16>
    tpu.vector_store %arg4[%c0_6, %c0_7], %7 {strides = array<i32>} : memref<128x128xbf16, #tpu.memory_space<vmem>>, vector<128x128xbf16>,
    %9 = vector.extract_strided_slice %5 {offsets = [0, 128], sizes = [128, 16], strides = [1, 1]} : vector<128x144xf32> to vector<128x16xf32>
    %c0_8 = arith.constant 0 : index
    %c0_9 = arith.constant 0 : index
    %10 = vector.load %arg5[%c0_8, %c0_9] : memref<128x16xf32, #tpu.memory_space<vmem>>, vector<128x16xf32>
    tpu.vector_store %arg5[%c0_8, %c0_9], %9 {strides = array<i32>} : memref<128x16xf32, #tpu.memory_space<vmem>>, vector<128x16xf32>,
    return
  }
  func.func @transform_0(%arg0: i32) -> (i32, i32) {
    %c0_i32 = arith.constant 0 : i32
    %c0_i32_0 = arith.constant 0 : i32
    return %arg0, %c0_i32 : i32, i32
  }
  func.func @transform_1(%arg0: i32) -> (i32, i32) {
    %c0_i32 = arith.constant 0 : i32
    %c0_i32_0 = arith.constant 0 : i32
    %c0_i32_1 = arith.constant 0 : i32
    return %c0_i32, %c0_i32_0 : i32, i32
  }
  func.func @transform_2(%arg0: i32) -> (i32, i32) {
    %c0_i32 = arith.constant 0 : i32
    %c0_i32_0 = arith.constant 0 : i32
    %c0_i32_1 = arith.constant 0 : i32
    return %c0_i32, %c0_i32_0 : i32, i32
  }
  func.func @transform_3(%arg0: i32) -> (i32, i32) {
    %c0_i32 = arith.constant 0 : i32
    %c0_i32_0 = arith.constant 0 : i32
    return %arg0, %c0_i32 : i32, i32
  }
  func.func @transform_4(%arg0: i32) -> (i32, i32) {
    %c0_i32 = arith.constant 0 : i32
    %c0_i32_0 = arith.constant 0 : i32
    return %arg0, %c0_i32 : i32, i32
  }
}

</mosaic_0001>

<bundles_post_ra>
// kernel: tpu_custom_call.1
= control target key start
LH: loop header
LB: loop body
LE: loop exit
PB: predicated region body
PF: predicated region fallthrough
CT: control target
= control target key end

     0   :  { %10 = vsyncpa [#allocation3], 0  ;;  %s1151_s0 = inlined_call_operand.vmem [shape: bf16[256,24], index: 0, kind: input, shape index: {}]   ;;  %s1152_s1 = inlined_call_operand.vmem [shape: bf16[24,32], index: 1, kind: input, shape index: {}]   ;;  %s1153_s2 = inlined_call_operand.vmem [shape: bf16[32,144], index: 2, kind: input, shape index: {}]   ;;  %s1154_s3 = inlined_call_operand.hbm [shape: bf16[256,128], index: 3, kind: output, shape index: {0}]   ;;  %s1155_s4 = inlined_call_operand.vmem [shape: f32[256,16], index: 4, kind: output, shape index: {1}]  }
   0x1   :  { %12 = vsyncpa [#allocation3 + $0x1], 0  ;;  %s965_s15 = smov 0   ;;  %s967_s16 = smov 0  }
   0x2   :  { %s969_s17 = smov 0   ;;  %s971_s18 = smov 0  }
   0x3 LB: > { %s986_s19 = sadd.s32 4294967295, %s936_s18   ;;  %s676_s20 = sadd.s32 4294967294, %s936_s18   ;;  %s936_s18 = sphi %s971_s18, %s1161_s18   ;;  %s932_s17 = sphi %s969_s17, %s1160_s17   ;;  %s928_s16 = sphi %s967_s16, %s1159_s16   ;;  %s924_s15 = sphi %s965_s15, %s1158_s15  }
   0x4   : > { %s990_s21 = sadd.s32 1, %s936_s18   ;;  %s93_s22 = sadd.s32 1, %s932_s17 }
   0x5   : > { %s90_s23 = ssub.s32 %s936_s18, %s990_s21  ;;  %p103_p0 = scmp.ne.s32.totalorder %s932_s17, %s928_s16 }
   0x6   : > { %p91_p1 = scmp.eq.s32.totalorder %s90_s23, 0  ;;  %p104_p2 = scmp.eq.s32.totalorder %s986_s19, 1 }
   0x7   : > { %p109_p3 = scmp.ne.s32.totalorder %s928_s16, %s924_s15  ;;  %p110_p4 = scmp.eq.s32.totalorder %s676_s20, 1 }
   0x8   : > { %s1001_s24 = scalar_select %p91_p1, %s932_s17, %s93_s22  }
   0x9   : > { %p1003_p5 = por %p104_p2, %p103_p0  ;;  %p1007_p6 = por %p110_p4, %p109_p3 }
   0xa   : > { %p679_p7 = scmp.ge.s32.totalorder %s936_s18, 1  ;;  %p169_p8 = scmp.lt.s32.totalorder %s936_s18, 3 }
   0xc   : > { %p170_p9 = pnand %p679_p7, %p169_p8 }
   0xd   : > { %s681_s29 = sshll.u32 (!%p170_p9), %s986_s19, 4  ;;  %s190_s11 = sand.u32 (!%p170_p9), 1, %s928_s16  }
   0xe   : > { %173 = sbr.rel (%p170_p9) target bundleno = 389 (0x185), region = 32  ;;  %p201_p10 = scmp.lt.s32.totalorder (!%p170_p9), %s681_s29, 31 }
   0xf   : > { %s680_s20 = sshll.u32 (!%p170_p9), %s190_s11, 6  ;;  %s565_s6 = scalar_lea.sflag (!%p170_p9), [#allocation3], %s190_s11 }
  0x10   : > { %s1077_s22 = scalar_lea.vmem (!%p170_p9), [#allocation2], %s680_s20 }
  0x13   : > { %v232_v0 = vld [vmem:[%s1152_s1 + $0x8] sm:$0xf]  ;;  %vm307_vm0 = vcmask 1043456   ;;  %s1163_s29 = smov (!%p201_p10, %s681_s29), 31  ;;  %v774_v4 = vld [vmem:[%s1152_s1] sm:$0xff]  ;;  %vm282_vm1 = vcmask 195584  }
  0x14   : > { %v278_v1 = vunpack.c.l.b16 %v232_v0  ;;  %s682_s30 = sshll.u32 %s1163_s29, 2  ;;  %v739_v13 = vld [vmem:[%s1153_s2 + $0x10] sm:$0xf]  ;;  %v778_v14 = vld [vmem:[%s1153_s2 + $0x14] sm:$0xf0]  ;;  %vm392_vm2 = vcmask 261120  }
  0x15   : > { %s204_s9 = scalar_lea.vmem %s1151_s0, %s682_s30  ;;  %v777_v15 = vld [vmem:[%s1153_s2 + $0x14] sm:$0xf]  ;;  %v740_v16 = vor.u32 %v778_v14, %v739_v13  ;;  %v741_v17 = vld [vmem:[%s1153_s2 + $0x18] sm:$0xf0]  ;;  %v731_v19 = vld [vmem:[%s1153_s2] sm:$0xf] }
  0x16   : > { %v280_v2 = vpack.c.b16 %v278_v1, %v278_v1  ;;  %v766_v5 = vld [vmem:[%s204_s9] sm:$0xff]  ;;  %v772_v6 = vld [vmem:[%s204_s9 + $0x30] sm:$0xff]  ;;  %v767_v7 = vld [vmem:[%s204_s9 + $0x8] sm:$0xff]  ;;  %v744_v18 = vor.u32 %v777_v15, %v741_v17  ;;  %s684_s10 = sshll.u32 %s1163_s29, 3  ;;  %vm547_vm3 = vcmask 130048   ;;  %s779_s29 = sshll.u32 %s986_s19, 6 }
  0x17   : > { %v773_v8 = vld [vmem:[%s204_s9 + $0x38] sm:$0xff]  ;;  %v768_v9 = vld [vmem:[%s204_s9 + $0x10] sm:$0xff]  ;;  %v770_v11 = vld [vmem:[%s204_s9 + $0x20] sm:$0xff]  ;;  %423 = vmatpush.bf16.msra.mxu1 %v740_v16  ;;  %s1071_s14 = scalar_lea.vmem %s1155_s4, %s684_s10  ;;  %s581_s28 = scalar_lea.hbm %s1154_s3, %s779_s29 }
  0x18   : > { %v309_v3 = vsel %vm307_vm0, %v280_v2, 0  ;;  %v769_v10 = vld [vmem:[%s204_s9 + $0x18] sm:$0xff]  ;;  %v771_v12 = vld [vmem:[%s204_s9 + $0x28] sm:$0xff]  ;;  %472 = vmatpush.bf16.msra.mxu2 %v744_v18  ;;  %v775_v21 = vld [vmem:[%s1153_s2 + $0x4] sm:$0xf]  ;;  %s582_s30 = sshll.u32 %s1077_s22, 4  ;;  %s583_s30 = int_to_ptr.vmem [resolvable:$true] %s582_s30 }
  0x19   : > { %317 = vmatpush.bf16.msra.mxu0 %v309_v3  ;;  %827 = vmatpush.bf16.msra.mxu3 %v309_v3  ;;  %v776_v20 = vld [vmem:[%s1153_s2 + $0x4] sm:$0xf0]  ;;  %v733_v23 = vld [vmem:[%s1153_s2 + $0x8] sm:$0xf0]  ;;  %s584_s5 = sshll.u32 %s581_s28, 4  ;;  %s894_s10 = scalar_lea.hbm %s1154_s3, 128  ;;  %s585_s5 = int_to_ptr.hbm [resolvable:$true] %s584_s5 }
  0x1a   : > { %v732_v22 = vor.u32 %v776_v20, %v731_v19  ;;  %v736_v24 = vor.u32 %v775_v21, %v733_v23  ;;  %s888_s7 = sshra.s32 %s585_s5, 4  ;;  %s889_s7 = int_to_ptr.hbm [resolvable:$true] %s888_s7 }
  0x1b   : > { %s890_s19 = scalar_lea.hbm %s889_s7, 64  ;;  %p895_p0 = scmp.lt.s32.totalorder %s889_s7, %s1154_s3 }
  0x1c   : > { %424 = vmatpush.bf16.msra.mxu1 %v732_v22  ;;  %473 = vmatpush.bf16.msra.mxu2 %v736_v24  ;;  %p891_p11 = scmp.ne.s32.totalorder %s889_s7, %s890_s19  ;;  %p896_p1 = scmp.lt.s32.totalorder %s894_s10, %s890_s19 }
  0x1d   : > { %318 = vmatpush.bf16.msra.mxu0 %v774_v4  ;;  %828 = vmatpush.bf16.msra.mxu3 %v774_v4 }
  0x1e   : > { %p892_p12 = pnand %p891_p11, %p1003_p5  ;;  %p897_p2 = por %p896_p1, %p895_p0 }
  0x20   : > { %721 = vmatmul.msk.bf16.vlgmr.msra.gmra.mxu0 %vm282_vm1, %v766_v5  ;;  %727 = vmatmul.msk.bf16.vlgmr.msra.gmra.mxu3 %vm282_vm1, %v772_v6  ;;  %p893_p13 = pneg %p892_p12 }
  0x21   : > { %829 = vmatpush.bf16.msrb.mxu3 %v740_v16 }
  0x22   : > { %p898_p3 = pnand %p897_p2, %p893_p13 }
  0x25   : > { %830 = vmatpush.bf16.msrb.mxu3 %v732_v22 }
  0x29   : > { %831 = vmatpush.bf16.msra.mxu3 %v744_v18 }
  0x2d   : > { %832 = vmatpush.bf16.msra.mxu3 %v736_v24 }
  0x30   : > { %722 = vmatmul.msk.bf16.gmra.mxu0 %vm282_vm1, %v767_v7  ;;  %728 = vmatmul.msk.bf16.gmra.mxu3 %vm282_vm1, %v773_v8 }
  0x40   : > { %723 = vmatmul.msk.bf16.gmra.mxu0 %vm282_vm1, %v768_v9 }
  0x50   : > { %724 = vmatmul.msk.bf16.gmra.mxu0 %vm282_vm1, %v769_v10 }
  0x60   : > { %725 = vmatmul.msk.bf16.gmra.mxu0 %vm282_vm1, %v770_v11 }
  0x70   : > { %726 = vmatmul.msk.bf16.gmra.mxu0 %vm282_vm1, %v771_v12 }
  0x9d   : > { %v320_v25 = vpop.f32.mrf.mxu0 }
  0xa3   : > { %v350_v26 = vpop.f32.mrf.mxu3 }
  0xa5   : > { %v322_v27 = vpop.f32.mrf.mxu0 }
  0xa6   : > { %v360_v28 = vpack.c.bf16 %v322_v27, %v320_v25 }
  0xa8   : > { %745 = vmatmul.msk.bf16.vlgmr.msra.gmra.mxu1 %vm392_vm2, %v360_v28  ;;  %753 = vmatmul.msk.bf16.vlgmr.msra.gmra.mxu2 %vm392_vm2, %v360_v28 }
  0xab   : > { %v352_v29 = vpop.f32.mrf.mxu3 }
  0xac   : > { %v366_v30 = vpack.c.bf16 %v352_v29, %v350_v26 }
  0xad   : > { %v325_v31 = vpop.f32.mrf.mxu0 }
  0xae   : > { %751 = vmatmul.msk.bf16.vlgmr.msrb.gmra.mxu3 %vm392_vm2, %v366_v30 }
  0xb3   : > { %v355_v32 = vpop.f32.mrf.mxu3 }
  0xb5   : > { %v327_v33 = vpop.f32.mrf.mxu0 }
  0xb6   : > { %v361_v34 = vpack.c.bf16 %v327_v33, %v325_v31 }
  0xb8   : > { %746 = vmatmul.msk.bf16.gmra.mxu1 %vm392_vm2, %v361_v34  ;;  %754 = vmatmul.msk.bf16.gmra.mxu2 %vm392_vm2, %v361_v34 }
  0xbb   : > { %v357_v35 = vpop.f32.mrf.mxu3 }
  0xbc   : > { %v367_v36 = vpack.c.bf16 %v357_v35, %v355_v32 }
  0xbd   : > { %v330_v37 = vpop.f32.mrf.mxu0 }
  0xbe   : > { %752 = vmatmul.msk.bf16.gmra.mxu3 %vm392_vm2, %v367_v36 }
  0xc5   : > { %v332_v38 = vpop.f32.mrf.mxu0 }
  0xc6   : > { %v362_v39 = vpack.c.bf16 %v332_v38, %v330_v37 }
  0xc8   : > { %747 = vmatmul.msk.bf16.gmra.mxu1 %vm392_vm2, %v362_v39  ;;  %755 = vmatmul.msk.bf16.gmra.mxu2 %vm392_vm2, %v362_v39 }
  0xcd   : > { %v335_v40 = vpop.f32.mrf.mxu0 }
  0xce   : > { %759 = vmatmul.msk.bf16.vlgmr.msra.gmra.mxu3 %vm392_vm2, %v366_v30 }
  0xd5   : > { %v337_v41 = vpop.f32.mrf.mxu0 }
  0xd6   : > { %v363_v42 = vpack.c.bf16 %v337_v41, %v335_v40 }
  0xd8   : > { %748 = vmatmul.msk.bf16.gmra.mxu1 %vm392_vm2, %v363_v42  ;;  %756 = vmatmul.msk.bf16.gmra.mxu2 %vm392_vm2, %v363_v42 }
  0xdd   : > { %v340_v43 = vpop.f32.mrf.mxu0 }
  0xde   : > { %760 = vmatmul.msk.bf16.gmra.mxu3 %vm392_vm2, %v367_v36 }
  0xe5   : > { %v342_v44 = vpop.f32.mrf.mxu0 }
  0xe6   : > { %v364_v45 = vpack.c.bf16 %v342_v44, %v340_v43 }
  0xe8   : > { %749 = vmatmul.msk.bf16.gmra.mxu1 %vm392_vm2, %v364_v45  ;;  %757 = vmatmul.msk.bf16.gmra.mxu2 %vm392_vm2, %v364_v45 }
  0xed   : > { %v345_v46 = vpop.f32.mrf.mxu0 }
  0xf5   : > { %v347_v47 = vpop.f32.mrf.mxu0 }
  0xf6   : > { %v365_v48 = vpack.c.bf16 %v347_v47, %v345_v46 }
  0xf8   : > { %750 = vmatmul.msk.bf16.gmra.mxu1 %vm392_vm2, %v365_v48  ;;  %758 = vmatmul.msk.bf16.gmra.mxu2 %vm392_vm2, %v365_v48 }
 0x125   : > { %v426_v49 = vpop.f32.mrf.mxu1 }
 0x12b   : > { %v475_v50 = vpop.f32.mrf.mxu2 }
 0x12c   : > { %548 = vst.msk [vmem:[%s1071_s14] sm:$0xff] %vm547_vm3, %v475_v50 }
 0x12d   : > { %v428_v51 = vpop.f32.mrf.mxu1 }
 0x12e   : > { %v783_v52 = vpack.c.bf16 %v428_v51, %v426_v49 }
 0x130   : > { %784 = vst [vmem:[%s1077_s22] sm:$0xff] %v783_v52  }
 0x131   : > { %v456_v53 = vpop.f32.mrf.mxu3 }
 0x133   : > { %v477_v54 = vpop.f32.mrf.mxu2 }
 0x134   : > { %549 = vst.msk [vmem:[%s1071_s14 + $0x8] sm:$0xff] %vm547_vm3, %v477_v54 }
 0x135   : > { %v431_v55 = vpop.f32.mrf.mxu1 }
 0x139   : > { %v458_v56 = vpop.f32.mrf.mxu3 }
 0x13a   : > { %v813_v57 = vpack.c.bf16 %v458_v56, %v456_v53 }
 0x13b   : > { %v480_v58 = vpop.f32.mrf.mxu2 }
 0x13c   : > { %825 = vst [vmem:[%s1077_s22 + $0x30] sm:$0xff] %v813_v57  }
 0x13d   : > { %550 = vst.msk [vmem:[%s1071_s14 + $0x10] sm:$0xff] %vm547_vm3, %v480_v58  ;;  %v433_v59 = vpop.f32.mrf.mxu1 }
 0x13e   : > { %v788_v60 = vpack.c.bf16 %v433_v59, %v431_v55 }
 0x140   : > { %820 = vst [vmem:[%s1077_s22 + $0x8] sm:$0xff] %v788_v60  }
 0x141   : > { %v461_v61 = vpop.f32.mrf.mxu3 }
 0x143   : > { %v482_v62 = vpop.f32.mrf.mxu2 }
 0x144   : > { %551 = vst.msk [vmem:[%s1071_s14 + $0x18] sm:$0xff] %vm547_vm3, %v482_v62 }
 0x145   : > { %v436_v63 = vpop.f32.mrf.mxu1 }
 0x149   : > { %v463_v0 = vpop.f32.mrf.mxu3 }
 0x14a   : > { %v818_v1 = vpack.c.bf16 %v463_v0, %v461_v61 }
 0x14b   : > { %v485_v2 = vpop.f32.mrf.mxu2 }
 0x14c   : > { %826 = vst [vmem:[%s1077_s22 + $0x38] sm:$0xff] %v818_v1  }
 0x14d   : > { %552 = vst.msk [vmem:[%s1071_s14 + $0x20] sm:$0xff] %vm547_vm3, %v485_v2  ;;  %v438_v3 = vpop.f32.mrf.mxu1 }
 0x14e   : > { %v793_v4 = vpack.c.bf16 %v438_v3, %v436_v63 }
 0x150   : > { %821 = vst [vmem:[%s1077_s22 + $0x10] sm:$0xff] %v793_v4  }
 0x151   : > { %v505_v5 = vpop.f32.mrf.mxu3 }
 0x152   : > { %560 = vst.msk [vmem:[%s1071_s14 + $0x60] sm:$0xff] %vm547_vm3, %v505_v5 }
 0x153   : > { %v487_v6 = vpop.f32.mrf.mxu2 }
 0x154   : > { %553 = vst.msk [vmem:[%s1071_s14 + $0x28] sm:$0xff] %vm547_vm3, %v487_v6 }
 0x155   : > { %v441_v7 = vpop.f32.mrf.mxu1 }
 0x159   : > { %v507_v8 = vpop.f32.mrf.mxu3 }
 0x15a   : > { %561 = vst.msk [vmem:[%s1071_s14 + $0x68] sm:$0xff] %vm547_vm3, %v507_v8 }
 0x15b   : > { %v490_v9 = vpop.f32.mrf.mxu2 }
 0x15c   : > { %554 = vst.msk [vmem:[%s1071_s14 + $0x30] sm:$0xff] %vm547_vm3, %v490_v9 }
 0x15d   : > { %v443_v10 = vpop.f32.mrf.mxu1 }
 0x15e   : > { %v798_v11 = vpack.c.bf16 %v443_v10, %v441_v7 }
 0x160   : > { %822 = vst [vmem:[%s1077_s22 + $0x18] sm:$0xff] %v798_v11  }
 0x161   : > { %v510_v12 = vpop.f32.mrf.mxu3 }
 0x162   : > { %562 = vst.msk [vmem:[%s1071_s14 + $0x70] sm:$0xff] %vm547_vm3, %v510_v12 }
 0x163   : > { %v492_v13 = vpop.f32.mrf.mxu2 }
 0x164   : > { %555 = vst.msk [vmem:[%s1071_s14 + $0x38] sm:$0xff] %vm547_vm3, %v492_v13 }
 0x165   : > { %v446_v14 = vpop.f32.mrf.mxu1 }
 0x169   : > { %v512_v15 = vpop.f32.mrf.mxu3 }
 0x16a   : > { %563 = vst.msk [vmem:[%s1071_s14 + $0x78] sm:$0xff] %vm547_vm3, %v512_v15 }
 0x16b   : > { %v495_v16 = vpop.f32.mrf.mxu2 }
 0x16c   : > { %556 = vst.msk [vmem:[%s1071_s14 + $0x40] sm:$0xff] %vm547_vm3, %v495_v16 }
 0x16d   : > { %v448_v17 = vpop.f32.mrf.mxu1 }
 0x16e   : > { %v803_v18 = vpack.c.bf16 %v448_v17, %v446_v14 }
 0x170   : > { %823 = vst [vmem:[%s1077_s22 + $0x20] sm:$0xff] %v803_v18  }
 0x173   : > { %v497_v19 = vpop.f32.mrf.mxu2 }
 0x174   : > { %557 = vst.msk [vmem:[%s1071_s14 + $0x48] sm:$0xff] %vm547_vm3, %v497_v19 }
 0x175   : > { %v451_v20 = vpop.f32.mrf.mxu1 }
 0x17b   : > { %v500_v21 = vpop.f32.mrf.mxu2 }
 0x17c   : > { %558 = vst.msk [vmem:[%s1071_s14 + $0x50] sm:$0xff] %vm547_vm3, %v500_v21 }
 0x17d   : > { %v453_v22 = vpop.f32.mrf.mxu1 }
 0x17e   : > { %v808_v23 = vpack.c.bf16 %v453_v22, %v451_v20 }
 0x180   : > { %824 = vst [vmem:[%s1077_s22 + $0x28] sm:$0xff] %v808_v23  }
 0x181   : > { %901 = shalt.err (!%p898_p3)
}
 0x182   : > { %s938_s11 = smov 64   ;;  %s939_s20 = smov 4  }
 0x183   : > { %833 = dma.vmem_to_hbm [thread:$0]  (%p1003_p5), %s583_s30, 1024, %s585_s5, %s565_s6, %s938_s11, %s938_s11, %s939_s20   ;;  %v502_v24 = vpop.f32.mrf.mxu2 }
 0x184   : > { %559 = vst.msk [vmem:[%s1071_s14 + $0x58] sm:$0xff] %vm547_vm3, %v502_v24 }
 0x185 PF: > { %p839_p4 = scmp.ge.s32.totalorder %s936_s18, 2  ;;  %s603_s22 = sand.u32 1, %s924_s15  }
 0x186   : > { %s604_s29 = scalar_lea.sflag [#allocation3], %s603_s22 }
 0x187   : > { %p836_p7 = pnand %p839_p4, %p1007_p6 }
 0x189   : > { %p837_p8 = pneg %p836_p7 }
 0x18b   : > { %919 = dma.done.wait (%p837_p8), %s604_s29, 1024  }
 0x18c   : > { %921 = vsyncadd (%p837_p8), %s604_s29, 4294966272  ;;  %p15_p5 = scmp.ge.s32.totalorder %s990_s21, 4   ;;  %s1158_s15 = smov %s928_s16 }
 0x18d   : > { %s1159_s16 = smov %s932_s17  ;;  %s1160_s17 = smov %s1001_s24 }
 0x18e   : > { %s1161_s18 = smov %s990_s21  ;;  %17 = sbr.rel (!%p15_p5) target bundleno = 3 (0x3), region = 79 }
 0x193   :  { %618 = vsyncpa [#allocation3], 1 }
 0x194   :  { %620 = vsyncpa [#allocation3 + $0x1], 1 }

// kernel: tpu_custom_call.1
= control target key start
LH: loop header
LB: loop body
LE: loop exit
PB: predicated region body
PF: predicated region fallthrough
CT: control target
= control target key end

     0   :  { %10 = vsyncpa [#allocation3], 0  ;;  %s1151_s0 = inlined_call_operand.vmem [shape: bf16[256,24], index: 0, kind: input, shape index: {}]   ;;  %s1152_s1 = inlined_call_operand.vmem [shape: bf16[24,32], index: 1, kind: input, shape index: {}]   ;;  %s1153_s2 = inlined_call_operand.vmem [shape: bf16[32,144], index: 2, kind: input, shape index: {}]   ;;  %s1154_s3 = inlined_call_operand.hbm [shape: bf16[256,128], index: 3, kind: output, shape index: {0}]   ;;  %s1155_s4 = inlined_call_operand.vmem [shape: f32[256,16], index: 4, kind: output, shape index: {1}]  }
   0x1   :  { %12 = vsyncpa [#allocation3 + $0x1], 0  ;;  %s965_s15 = smov 0   ;;  %s967_s16 = smov 0  }
   0x2   :  { %s969_s17 = smov 0   ;;  %s971_s18 = smov 0  }
   0x3 LB: > { %s986_s19 = sadd.s32 4294967295, %s936_s18   ;;  %s676_s20 = sadd.s32 4294967294, %s936_s18   ;;  %s936_s18 = sphi %s971_s18, %s1161_s18   ;;  %s932_s17 = sphi %s969_s17, %s1160_s17   ;;  %s928_s16 = sphi %s967_s16, %s1159_s16   ;;  %s924_s15 = sphi %s965_s15, %s1158_s15  }
   0x4   : > { %s990_s21 = sadd.s32 1, %s936_s18   ;;  %s93_s22 = sadd.s32 1, %s932_s17 }
   0x5   : > { %s90_s23 = ssub.s32 %s936_s18, %s990_s21  ;;  %p103_p0 = scmp.ne.s32.totalorder %s932_s17, %s928_s16 }
   0x6   : > { %p91_p1 = scmp.eq.s32.totalorder %s90_s23, 0  ;;  %p104_p2 = scmp.eq.s32.totalorder %s986_s19, 1 }
   0x7   : > { %p109_p3 = scmp.ne.s32.totalorder %s928_s16, %s924_s15  ;;  %p110_p4 = scmp.eq.s32.totalorder %s676_s20, 1 }
   0x8   : > { %s1001_s24 = scalar_select %p91_p1, %s932_s17, %s93_s22  }
   0x9   : > { %p1003_p5 = por %p104_p2, %p103_p0  ;;  %p1007_p6 = por %p110_p4, %p109_p3 }
   0xa   : > { %p679_p7 = scmp.ge.s32.totalorder %s936_s18, 1  ;;  %p169_p8 = scmp.lt.s32.totalorder %s936_s18, 3 }
   0xc   : > { %p170_p9 = pnand %p679_p7, %p169_p8 }
   0xd   : > { %s681_s29 = sshll.u32 (!%p170_p9), %s986_s19, 4  ;;  %s190_s11 = sand.u32 (!%p170_p9), 1, %s928_s16  }
   0xe   : > { %173 = sbr.rel (%p170_p9) target bundleno = 389 (0x185), region = 32  ;;  %p201_p10 = scmp.lt.s32.totalorder (!%p170_p9), %s681_s29, 31 }
   0xf   : > { %s680_s20 = sshll.u32 (!%p170_p9), %s190_s11, 6  ;;  %s565_s6 = scalar_lea.sflag (!%p170_p9), [#allocation3], %s190_s11 }
  0x10   : > { %s1077_s22 = scalar_lea.vmem (!%p170_p9), [#allocation2], %s680_s20 }
  0x13   : > { %v232_v0 = vld [vmem:[%s1152_s1 + $0x8] sm:$0xf]  ;;  %vm307_vm0 = vcmask 1043456   ;;  %s1163_s29 = smov (!%p201_p10, %s681_s29), 31  ;;  %v774_v4 = vld [vmem:[%s1152_s1] sm:$0xff]  ;;  %vm282_vm1 = vcmask 195584  }
  0x14   : > { %v278_v1 = vunpack.c.l.b16 %v232_v0  ;;  %s682_s30 = sshll.u32 %s1163_s29, 2  ;;  %v739_v13 = vld [vmem:[%s1153_s2 + $0x10] sm:$0xf]  ;;  %v778_v14 = vld [vmem:[%s1153_s2 + $0x14] sm:$0xf0]  ;;  %vm392_vm2 = vcmask 261120  }
  0x15   : > { %s204_s9 = scalar_lea.vmem %s1151_s0, %s682_s30  ;;  %v777_v15 = vld [vmem:[%s1153_s2 + $0x14] sm:$0xf]  ;;  %v740_v16 = vor.u32 %v778_v14, %v739_v13  ;;  %v741_v17 = vld [vmem:[%s1153_s2 + $0x18] sm:$0xf0]  ;;  %v731_v19 = vld [vmem:[%s1153_s2] sm:$0xf] }
  0x16   : > { %v280_v2 = vpack.c.b16 %v278_v1, %v278_v1  ;;  %v766_v5 = vld [vmem:[%s204_s9] sm:$0xff]  ;;  %v772_v6 = vld [vmem:[%s204_s9 + $0x30] sm:$0xff]  ;;  %v767_v7 = vld [vmem:[%s204_s9 + $0x8] sm:$0xff]  ;;  %v744_v18 = vor.u32 %v777_v15, %v741_v17  ;;  %s684_s10 = sshll.u32 %s1163_s29, 3  ;;  %vm547_vm3 = vcmask 130048   ;;  %s779_s29 = sshll.u32 %s986_s19, 6 }
  0x17   : > { %v773_v8 = vld [vmem:[%s204_s9 + $0x38] sm:$0xff]  ;;  %v768_v9 = vld [vmem:[%s204_s9 + $0x10] sm:$0xff]  ;;  %v770_v11 = vld [vmem:[%s204_s9 + $0x20] sm:$0xff]  ;;  %423 = vmatpush.bf16.msra.mxu1 %v740_v16  ;;  %s1071_s14 = scalar_lea.vmem %s1155_s4, %s684_s10  ;;  %s581_s28 = scalar_lea.hbm %s1154_s3, %s779_s29 }
  0x18   : > { %v309_v3 = vsel %vm307_vm0, %v280_v2, 0  ;;  %v769_v10 = vld [vmem:[%s204_s9 + $0x18] sm:$0xff]  ;;  %v771_v12 = vld [vmem:[%s204_s9 + $0x28] sm:$0xff]  ;;  %472 = vmatpush.bf16.msra.mxu2 %v744_v18  ;;  %v775_v21 = vld [vmem:[%s1153_s2 + $0x4] sm:$0xf]  ;;  %s582_s30 = sshll.u32 %s1077_s22, 4  ;;  %s583_s30 = int_to_ptr.vmem [resolvable:$true] %s582_s30 }
  0x19   : > { %317 = vmatpush.bf16.msra.mxu0 %v309_v3  ;;  %827 = vmatpush.bf16.msra.mxu3 %v309_v3  ;;  %v776_v20 = vld [vmem:[%s1153_s2 + $0x4] sm:$0xf0]  ;;  %v733_v23 = vld [vmem:[%s1153_s2 + $0x8] sm:$0xf0]  ;;  %s584_s5 = sshll.u32 %s581_s28, 4  ;;  %s894_s10 = scalar_lea.hbm %s1154_s3, 128  ;;  %s585_s5 = int_to_ptr.hbm [resolvable:$true] %s584_s5 }
  0x1a   : > { %v732_v22 = vor.u32 %v776_v20, %v731_v19  ;;  %v736_v24 = vor.u32 %v775_v21, %v733_v23  ;;  %s888_s7 = sshra.s32 %s585_s5, 4  ;;  %s889_s7 = int_to_ptr.hbm [resolvable:$true] %s888_s7 }
  0x1b   : > { %s890_s19 = scalar_lea.hbm %s889_s7, 64  ;;  %p895_p0 = scmp.lt.s32.totalorder %s889_s7, %s1154_s3 }
  0x1c   : > { %424 = vmatpush.bf16.msra.mxu1 %v732_v22  ;;  %473 = vmatpush.bf16.msra.mxu2 %v736_v24  ;;  %p891_p11 = scmp.ne.s32.totalorder %s889_s7, %s890_s19  ;;  %p896_p1 = scmp.lt.s32.totalorder %s894_s10, %s890_s19 }
  0x1d   : > { %318 = vmatpush.bf16.msra.mxu0 %v774_v4  ;;  %828 = vmatpush.bf16.msra.mxu3 %v774_v4 }
  0x1e   : > { %p892_p12 = pnand %p891_p11, %p1003_p5  ;;  %p897_p2 = por %p896_p1, %p895_p0 }
  0x20   : > { %721 = vmatmul.msk.bf16.vlgmr.msra.gmra.mxu0 %vm282_vm1, %v766_v5  ;;  %727 = vmatmul.msk.bf16.vlgmr.msra.gmra.mxu3 %vm282_vm1, %v772_v6  ;;  %p893_p13 = pneg %p892_p12 }
  0x21   : > { %829 = vmatpush.bf16.msrb.mxu3 %v740_v16 }
  0x22   : > { %p898_p3 = pnand %p897_p2, %p893_p13 }
  0x25   : > { %830 = vmatpush.bf16.msrb.mxu3 %v732_v22 }
  0x29   : > { %831 = vmatpush.bf16.msra.mxu3 %v744_v18 }
  0x2d   : > { %832 = vmatpush.bf16.msra.mxu3 %v736_v24 }
  0x30   : > { %722 = vmatmul.msk.bf16.gmra.mxu0 %vm282_vm1, %v767_v7  ;;  %728 = vmatmul.msk.bf16.gmra.mxu3 %vm282_vm1, %v773_v8 }
  0x40   : > { %723 = vmatmul.msk.bf16.gmra.mxu0 %vm282_vm1, %v768_v9 }
  0x50   : > { %724 = vmatmul.msk.bf16.gmra.mxu0 %vm282_vm1, %v769_v10 }
  0x60   : > { %725 = vmatmul.msk.bf16.gmra.mxu0 %vm282_vm1, %v770_v11 }
  0x70   : > { %726 = vmatmul.msk.bf16.gmra.mxu0 %vm282_vm1, %v771_v12 }
  0x9d   : > { %v320_v25 = vpop.f32.mrf.mxu0 }
  0xa3   : > { %v350_v26 = vpop.f32.mrf.mxu3 }
  0xa5   : > { %v322_v27 = vpop.f32.mrf.mxu0 }
  0xa6   : > { %v360_v28 = vpack.c.bf16 %v322_v27, %v320_v25 }
  0xa8   : > { %745 = vmatmul.msk.bf16.vlgmr.msra.gmra.mxu1 %vm392_vm2, %v360_v28  ;;  %753 = vmatmul.msk.bf16.vlgmr.msra.gmra.mxu2 %vm392_vm2, %v360_v28 }
  0xab   : > { %v352_v29 = vpop.f32.mrf.mxu3 }
  0xac   : > { %v366_v30 = vpack.c.bf16 %v352_v29, %v350_v26 }
  0xad   : > { %v325_v31 = vpop.f32.mrf.mxu0 }
  0xae   : > { %751 = vmatmul.msk.bf16.vlgmr.msrb.gmra.mxu3 %vm392_vm2, %v366_v30 }
  0xb3   : > { %v355_v32 = vpop.f32.mrf.mxu3 }
  0xb5   : > { %v327_v33 = vpop.f32.mrf.mxu0 }
  0xb6   : > { %v361_v34 = vpack.c.bf16 %v327_v33, %v325_v31 }
  0xb8   : > { %746 = vmatmul.msk.bf16.gmra.mxu1 %vm392_vm2, %v361_v34  ;;  %754 = vmatmul.msk.bf16.gmra.mxu2 %vm392_vm2, %v361_v34 }
  0xbb   : > { %v357_v35 = vpop.f32.mrf.mxu3 }
  0xbc   : > { %v367_v36 = vpack.c.bf16 %v357_v35, %v355_v32 }
  0xbd   : > { %v330_v37 = vpop.f32.mrf.mxu0 }
  0xbe   : > { %752 = vmatmul.msk.bf16.gmra.mxu3 %vm392_vm2, %v367_v36 }
  0xc5   : > { %v332_v38 = vpop.f32.mrf.mxu0 }
  0xc6   : > { %v362_v39 = vpack.c.bf16 %v332_v38, %v330_v37 }
  0xc8   : > { %747 = vmatmul.msk.bf16.gmra.mxu1 %vm392_vm2, %v362_v39  ;;  %755 = vmatmul.msk.bf16.gmra.mxu2 %vm392_vm2, %v362_v39 }
  0xcd   : > { %v335_v40 = vpop.f32.mrf.mxu0 }
  0xce   : > { %759 = vmatmul.msk.bf16.vlgmr.msra.gmra.mxu3 %vm392_vm2, %v366_v30 }
  0xd5   : > { %v337_v41 = vpop.f32.mrf.mxu0 }
  0xd6   : > { %v363_v42 = vpack.c.bf16 %v337_v41, %v335_v40 }
  0xd8   : > { %748 = vmatmul.msk.bf16.gmra.mxu1 %vm392_vm2, %v363_v42  ;;  %756 = vmatmul.msk.bf16.gmra.mxu2 %vm392_vm2, %v363_v42 }
  0xdd   : > { %v340_v43 = vpop.f32.mrf.mxu0 }
  0xde   : > { %760 = vmatmul.msk.bf16.gmra.mxu3 %vm392_vm2, %v367_v36 }
  0xe5   : > { %v342_v44 = vpop.f32.mrf.mxu0 }
  0xe6   : > { %v364_v45 = vpack.c.bf16 %v342_v44, %v340_v43 }
  0xe8   : > { %749 = vmatmul.msk.bf16.gmra.mxu1 %vm392_vm2, %v364_v45  ;;  %757 = vmatmul.msk.bf16.gmra.mxu2 %vm392_vm2, %v364_v45 }
  0xed   : > { %v345_v46 = vpop.f32.mrf.mxu0 }
  0xf5   : > { %v347_v47 = vpop.f32.mrf.mxu0 }
  0xf6   : > { %v365_v48 = vpack.c.bf16 %v347_v47, %v345_v46 }
  0xf8   : > { %750 = vmatmul.msk.bf16.gmra.mxu1 %vm392_vm2, %v365_v48  ;;  %758 = vmatmul.msk.bf16.gmra.mxu2 %vm392_vm2, %v365_v48 }
 0x125   : > { %v426_v49 = vpop.f32.mrf.mxu1 }
 0x12b   : > { %v475_v50 = vpop.f32.mrf.mxu2 }
 0x12c   : > { %548 = vst.msk [vmem:[%s1071_s14] sm:$0xff] %vm547_vm3, %v475_v50 }
 0x12d   : > { %v428_v51 = vpop.f32.mrf.mxu1 }
 0x12e   : > { %v783_v52 = vpack.c.bf16 %v428_v51, %v426_v49 }
 0x130   : > { %784 = vst [vmem:[%s1077_s22] sm:$0xff] %v783_v52  }
 0x131   : > { %v456_v53 = vpop.f32.mrf.mxu3 }
 0x133   : > { %v477_v54 = vpop.f32.mrf.mxu2 }
 0x134   : > { %549 = vst.msk [vmem:[%s1071_s14 + $0x8] sm:$0xff] %vm547_vm3, %v477_v54 }
 0x135   : > { %v431_v55 = vpop.f32.mrf.mxu1 }
 0x139   : > { %v458_v56 = vpop.f32.mrf.mxu3 }
 0x13a   : > { %v813_v57 = vpack.c.bf16 %v458_v56, %v456_v53 }
 0x13b   : > { %v480_v58 = vpop.f32.mrf.mxu2 }
 0x13c   : > { %825 = vst [vmem:[%s1077_s22 + $0x30] sm:$0xff] %v813_v57  }
 0x13d   : > { %550 = vst.msk [vmem:[%s1071_s14 + $0x10] sm:$0xff] %vm547_vm3, %v480_v58  ;;  %v433_v59 = vpop.f32.mrf.mxu1 }
 0x13e   : > { %v788_v60 = vpack.c.bf16 %v433_v59, %v431_v55 }
 0x140   : > { %820 = vst [vmem:[%s1077_s22 + $0x8] sm:$0xff] %v788_v60  }
 0x141   : > { %v461_v61 = vpop.f32.mrf.mxu3 }
 0x143   : > { %v482_v62 = vpop.f32.mrf.mxu2 }
 0x144   : > { %551 = vst.msk [vmem:[%s1071_s14 + $0x18] sm:$0xff] %vm547_vm3, %v482_v62 }
 0x145   : > { %v436_v63 = vpop.f32.mrf.mxu1 }
 0x149   : > { %v463_v0 = vpop.f32.mrf.mxu3 }
 0x14a   : > { %v818_v1 = vpack.c.bf16 %v463_v0, %v461_v61 }
 0x14b   : > { %v485_v2 = vpop.f32.mrf.mxu2 }
 0x14c   : > { %826 = vst [vmem:[%s1077_s22 + $0x38] sm:$0xff] %v818_v1  }
 0x14d   : > { %552 = vst.msk [vmem:[%s1071_s14 + $0x20] sm:$0xff] %vm547_vm3, %v485_v2  ;;  %v438_v3 = vpop.f32.mrf.mxu1 }
 0x14e   : > { %v793_v4 = vpack.c.bf16 %v438_v3, %v436_v63 }
 0x150   : > { %821 = vst [vmem:[%s1077_s22 + $0x10] sm:$0xff] %v793_v4  }
 0x151   : > { %v505_v5 = vpop.f32.mrf.mxu3 }
 0x152   : > { %560 = vst.msk [vmem:[%s1071_s14 + $0x60] sm:$0xff] %vm547_vm3, %v505_v5 }
 0x153   : > { %v487_v6 = vpop.f32.mrf.mxu2 }
 0x154   : > { %553 = vst.msk [vmem:[%s1071_s14 + $0x28] sm:$0xff] %vm547_vm3, %v487_v6 }
 0x155   : > { %v441_v7 = vpop.f32.mrf.mxu1 }
 0x159   : > { %v507_v8 = vpop.f32.mrf.mxu3 }
 0x15a   : > { %561 = vst.msk [vmem:[%s1071_s14 + $0x68] sm:$0xff] %vm547_vm3, %v507_v8 }
 0x15b   : > { %v490_v9 = vpop.f32.mrf.mxu2 }
 0x15c   : > { %554 = vst.msk [vmem:[%s1071_s14 + $0x30] sm:$0xff] %vm547_vm3, %v490_v9 }
 0x15d   : > { %v443_v10 = vpop.f32.mrf.mxu1 }
 0x15e   : > { %v798_v11 = vpack.c.bf16 %v443_v10, %v441_v7 }
 0x160   : > { %822 = vst [vmem:[%s1077_s22 + $0x18] sm:$0xff] %v798_v11  }
 0x161   : > { %v510_v12 = vpop.f32.mrf.mxu3 }
 0x162   : > { %562 = vst.msk [vmem:[%s1071_s14 + $0x70] sm:$0xff] %vm547_vm3, %v510_v12 }
 0x163   : > { %v492_v13 = vpop.f32.mrf.mxu2 }
 0x164   : > { %555 = vst.msk [vmem:[%s1071_s14 + $0x38] sm:$0xff] %vm547_vm3, %v492_v13 }
 0x165   : > { %v446_v14 = vpop.f32.mrf.mxu1 }
 0x169   : > { %v512_v15 = vpop.f32.mrf.mxu3 }
 0x16a   : > { %563 = vst.msk [vmem:[%s1071_s14 + $0x78] sm:$0xff] %vm547_vm3, %v512_v15 }
 0x16b   : > { %v495_v16 = vpop.f32.mrf.mxu2 }
 0x16c   : > { %556 = vst.msk [vmem:[%s1071_s14 + $0x40] sm:$0xff] %vm547_vm3, %v495_v16 }
 0x16d   : > { %v448_v17 = vpop.f32.mrf.mxu1 }
 0x16e   : > { %v803_v18 = vpack.c.bf16 %v448_v17, %v446_v14 }
 0x170   : > { %823 = vst [vmem:[%s1077_s22 + $0x20] sm:$0xff] %v803_v18  }
 0x173   : > { %v497_v19 = vpop.f32.mrf.mxu2 }
 0x174   : > { %557 = vst.msk [vmem:[%s1071_s14 + $0x48] sm:$0xff] %vm547_vm3, %v497_v19 }
 0x175   : > { %v451_v20 = vpop.f32.mrf.mxu1 }
 0x17b   : > { %v500_v21 = vpop.f32.mrf.mxu2 }
 0x17c   : > { %558 = vst.msk [vmem:[%s1071_s14 + $0x50] sm:$0xff] %vm547_vm3, %v500_v21 }
 0x17d   : > { %v453_v22 = vpop.f32.mrf.mxu1 }
 0x17e   : > { %v808_v23 = vpack.c.bf16 %v453_v22, %v451_v20 }
 0x180   : > { %824 = vst [vmem:[%s1077_s22 + $0x28] sm:$0xff] %v808_v23  }
 0x181   : > { %901 = shalt.err (!%p898_p3)
}
 0x182   : > { %s938_s11 = smov 64   ;;  %s939_s20 = smov 4  }
 0x183   : > { %833 = dma.vmem_to_hbm [thread:$0]  (%p1003_p5), %s583_s30, 1024, %s585_s5, %s565_s6, %s938_s11, %s938_s11, %s939_s20   ;;  %v502_v24 = vpop.f32.mrf.mxu2 }
 0x184   : > { %559 = vst.msk [vmem:[%s1071_s14 + $0x58] sm:$0xff] %vm547_vm3, %v502_v24 }
 0x185 PF: > { %p839_p4 = scmp.ge.s32.totalorder %s936_s18, 2  ;;  %s603_s22 = sand.u32 1, %s924_s15  }
 0x186   : > { %s604_s29 = scalar_lea.sflag [#allocation3], %s603_s22 }
 0x187   : > { %p836_p7 = pnand %p839_p4, %p1007_p6 }
 0x189   : > { %p837_p8 = pneg %p836_p7 }
 0x18b   : > { %919 = dma.done.wait (%p837_p8), %s604_s29, 1024  }
 0x18c   : > { %921 = vsyncadd (%p837_p8), %s604_s29, 4294966272  ;;  %p15_p5 = scmp.ge.s32.totalorder %s990_s21, 4   ;;  %s1158_s15 = smov %s928_s16 }
 0x18d   : > { %s1159_s16 = smov %s932_s17  ;;  %s1160_s17 = smov %s1001_s24 }
 0x18e   : > { %s1161_s18 = smov %s990_s21  ;;  %17 = sbr.rel (!%p15_p5) target bundleno = 3 (0x3), region = 79 }
 0x193   :  { %618 = vsyncpa [#allocation3], 1 }
 0x194   :  { %620 = vsyncpa [#allocation3 + $0x1], 1 }

</bundles_post_ra>
